<compile_context>
chip_gen: v6e
topology: v6e:2x2x1
jax: 0.10.0
libtpu: 0.0.40
codegen_flags: <defaults>
</compile_context>

<pallas_src>
import numpy as np
import jax
import jax.numpy as jnp
from jax.experimental import pallas as pl
from jax.experimental.pallas import tpu as pltpu


def _round_up(x, m):
    return (x + m - 1) // m * m


def _make_kernel(nseg, use_rep):
    def kernel(*refs):
        if use_rep:
            x_ref, consts_ref, rep_ref, rhs_ref, o_ref, a_ref = refs
        else:
            x_ref, consts_ref, rhs_ref, o_ref, a_ref = refs

        # A depends only on the batch tile: build it once (first output tile)
        # into the persistent VMEM scratch and reuse it for all output tiles.
        @pl.when(pl.program_id(1) == 0)
        def _():
            # Lower clamp only: x >= 1 already fails every `x < g_hi` test below,
            # which reproduces torch.clamp(x,-1,1) + half-open interval semantics.
            xc = jnp.maximum(x_ref[...].astype(jnp.float32), -1.0)       # (TB, J)
            if use_rep:
                # Small / lane-unaligned J: exact 0/1 replication matmul (tiny).
                xt = jnp.dot(xc, rep_ref[...],
                             preferred_element_type=jnp.float32)         # (TB, K)
            else:
                # Lane-aligned J: exact lane concatenation, no MXU, no rep matrix.
                xt = jnp.concatenate([xc] * nseg, axis=-1)                # (TB, K)

            c = consts_ref[...]                                           # (4, K)
            g_lo, g_hi, off, scale = c[0:1, :], c[1:2, :], c[2:3, :], c[3:4, :]
            # even segment lanes: mask * (1 - t) = mask * (g_hi - x)/dg
            # odd  segment lanes: mask *      t  = mask * (x - g_lo)/dg
            mask = (xt >= g_lo) & (xt < g_hi)
            a_ref[...] = jnp.where(mask, (xt - off) * scale, 0.0)

        # Single fused contraction over all (interval, input-feature) pairs.
        o_ref[...] = jnp.dot(a_ref[...], rhs_ref[...],
                             preferred_element_type=jnp.float32).astype(o_ref.dtype)

    return kernel


def prepare_simple_kan(coeff_gij, base_weight, grid_vals):
    """One-time (per weights) preprocessing.

    coeff_gij  : (G, I, J)  coefficient g of the B-spline on edge (i, j)
    base_weight: (I, J)
    grid_vals  : (G,)       knots (torch.linspace(-1, 1, G) in the module)
    """
    G, I, J = coeff_gij.shape
    assert base_weight.shape == (I, J) and len(grid_vals) == G and G >= 2
    nseg = 2 * (G - 1)
    K = nseg * J

    # Per-lane constants (4, K): g_lo, g_hi, offset, scale (reciprocals in f64).
    g = np.asarray(grid_vals, dtype=np.float64)
    g0, g1 = g[:-1], g[1:]
    inv = 1.0 / (g1 - g0)
    consts_seg = np.stack(
        [
            np.repeat(g0, 2),                            # g_lo per segment
            np.repeat(g1, 2),                            # g_hi per segment
            np.stack([g1, g0], axis=1).reshape(-1),      # offset (even: g_hi, odd: g_lo)
            np.stack([-inv, inv], axis=1).reshape(-1),   # scale  (even: -1/dg, odd: +1/dg)
        ],
        axis=0,
    )
    consts = jnp.asarray(np.repeat(consts_seg, J, axis=1), dtype=jnp.float32)  # (4, K)

    # Fallback lane-replication matrix, only when J is not lane-aligned.
    # TODO(synk): very large J that is not a multiple of 128 would make `rep`
    # big (quadratic in J); tile J or relayout x host-side in that case.
    use_rep = (J % 128 != 0)
    rep = (jnp.asarray(np.tile(np.eye(J, dtype=np.float32), (1, nseg)))
           if use_rep else None)                                               # (J, K)

    # Output-feature tile: prefer MXU-width multiples, bounded so the two RHS
    # pipeline buffers stay well under the scoped-VMEM limit on all chips.
    I_pad = _round_up(I, 128)
    TN = 128
    for cand in (512, 256):
        if I_pad % cand == 0 and 2 * K * cand * 4 <= (8 << 20):
            TN = cand
            break

    # Fused, pre-scaled spline coefficients (K, I_pad), segment-major rows.
    D = coeff_gij.astype(jnp.float32) * base_weight.astype(jnp.float32)[None]  # (G,I,J)
    seg_knot = np.stack([np.arange(G - 1), np.arange(1, G)], axis=1).reshape(-1)
    rhs = jnp.transpose(D[seg_knot], (0, 2, 1)).reshape(K, I)                  # (K, I)
    rhs = jnp.pad(rhs, ((0, 0), (0, I_pad - I)))                               # (K, I_pad)

    return dict(consts=consts, rep=rep, rhs=rhs, use_rep=use_rep,
                nseg=nseg, K=K, J=J, I=I, I_pad=I_pad, TN=TN)


def simple_kan_forward(x, params, *, block_b=1024):
    """x: (B, J) float32 -> (B, I) float32, matching SimpleKANLayer.forward."""
    B, J = x.shape
    assert J == params["J"]
    K, I, I_pad, TN = params["K"], params["I"], params["I_pad"], params["TN"]
    nseg, use_rep = params["nseg"], params["use_rep"]

    # Batch tile: as large as block_b allows, gated by K so the (TB, K) f32
    # temporaries (xt, A, matmul staging) stay well under the scoped-VMEM limit.
    cap = max(8, ((8 << 20) // (K * 4 * 3)) // 8 * 8)
    TB = max(8, min(_round_up(block_b, 8), cap, _round_up(B, 8)))
    n_b = pl.cdiv(B, TB)
    n_i = I_pad // TN

    kernel = _make_kernel(nseg, use_rep)

    in_specs = [
        pl.BlockSpec((TB, J), lambda b, i: (b, 0)),        # x: tiled over batch
        pl.BlockSpec((4, K), lambda b, i: (0, 0)),         # lane constants (resident)
    ]
    args = [x.astype(jnp.float32), params["consts"]]
    if use_rep:
        in_specs.append(pl.BlockSpec((J, K), lambda b, i: (0, 0)))   # rep (resident)
        args.append(params["rep"])
    in_specs.append(pl.BlockSpec((K, TN), lambda b, i: (0, i)))      # fused C*W tile
    args.append(params["rhs"])

    return pl.pallas_call(
        kernel,
        out_shape=jax.ShapeDtypeStruct((B, I), jnp.float32),   # unpadded: writes clipped
        grid=(n_b, n_i),
        in_specs=in_specs,
        out_specs=pl.BlockSpec((TB, TN), lambda b, i: (b, i)),
        scratch_shapes=[pltpu.VMEM((TB, K), jnp.float32)],     # A, reused across i tiles
        compiler_params=pltpu.CompilerParams(
            # batch axis may be sharded across TensorCores; the output-tile axis
            # reuses the A scratch computed at tile 0, so it must stay on-core.
            dimension_semantics=("parallel", "arbitrary"),
        ),
    )(*args)


def reference_forward(x, coeff_gij, base_weight, grid_vals):
    """Pure-JAX reference matching the PyTorch loops exactly."""
    xc = jnp.clip(x, -1.0, 1.0)                                # (B, J)
    B, J = x.shape
    G, I, _ = coeff_gij.shape
    act = jnp.zeros((B, I, J), dtype=jnp.float32)
    for k in range(G - 1):
        g0, g1 = float(grid_vals[k]), float(grid_vals[k + 1])
        mask = (xc >= g0) & (xc < g1)                          # (B, J)
        t = (xc - g0) / (g1 - g0)                              # (B, J)
        interp = ((1.0 - t)[:, None, :] * coeff_gij[k][None] +
                  t[:, None, :] * coeff_gij[k + 1][None])      # (B, I, J)
        act = act + jnp.where(mask[:, None, :], interp, 0.0)
    return jnp.sum(act * base_weight[None], axis=-1)           # (B, I)


if __name__ == "__main__":
    def run_case(batch, in_features, out_features, grid_size, seed, rtol, atol):
        key = jax.random.PRNGKey(seed)
        kx, kc, kw = jax.random.split(key, 3)
        x = jax.random.normal(kx, (batch, in_features), dtype=jnp.float32)
        # one BSplineActivation per (out i, in j) edge -> coefficients reordered to (G, I, J)
        coeff_ijg = jax.random.normal(
            kc, (out_features, in_features, grid_size), dtype=jnp.float32)
        coeff_gij = jnp.transpose(coeff_ijg, (2, 0, 1))
        base_weight = jax.random.normal(
            kw, (out_features, in_features), dtype=jnp.float32) * 0.1
        grid_vals = np.linspace(-1.0, 1.0, grid_size)          # registered buffer in PyTorch

        params = prepare_simple_kan(coeff_gij, base_weight, grid_vals)
        out = jax.block_until_ready(simple_kan_forward(x, params))
        ref = reference_forward(x, coeff_gij, base_weight, grid_vals)
        np.testing.assert_allclose(np.asarray(out), np.asarray(ref),
                                   rtol=rtol, atol=atol)

    # Small case (module defaults): exercises the rep-matmul fallback (J % 128 != 0)
    # and the masked (I < 128) output writeback.
    run_case(batch=8, in_features=16, out_features=32, grid_size=5,
             seed=0, rtol=1e-4, atol=1e-4)

    # Larger case: exercises the exact lane-concat broadcast (J % 128 == 0),
    # output-feature tiling (n_i > 1) and the partial last batch tile (B % TB != 0).
    run_case(batch=37, in_features=128, out_features=320, grid_size=6,
             seed=1, rtol=5e-4, atol=5e-4)

    print("KERNEL_OK")
</pallas_src>

<mosaic_0001>
module attributes {stable_mosaic.version = 11 : i64} {
  func.func @kernel(%arg0: i32, %arg1: i32, %arg2: memref<8x16xf32, #tpu.memory_space<vmem>>, %arg3: memref<4x128xf32, #tpu.memory_space<vmem>>, %arg4: memref<16x128xf32, #tpu.memory_space<vmem>>, %arg5: memref<128x128xf32, #tpu.memory_space<vmem>>, %arg6: memref<8x128xf32, #tpu.memory_space<vmem>>, %arg7: memref<8x128xf32, #tpu.memory_space<vmem>>) attributes {dimension_semantics = [#tpu.dimension_semantics<parallel>, #tpu.dimension_semantics<arbitrary>], iteration_bounds = array<i64: 1, 1>, scalar_prefetch = 0 : i64, scratch_operands = 1 : i64, tpu.core_type = #tpu.core_type<tc>, window_params = [{transform_indices = @transform_0, window_bounds = array<i64: 8, 16>}, {pipeline_mode = #tpu.pipeline_mode<synchronous>, transform_indices = @transform_1, window_bounds = array<i64: 4, 128>}, {pipeline_mode = #tpu.pipeline_mode<synchronous>, transform_indices = @transform_2, window_bounds = array<i64: 16, 128>}, {transform_indices = @transform_3, window_bounds = array<i64: 128, 128>}, {transform_indices = @transform_4, window_bounds = array<i64: 8, 128>}]} {
    %c0_i32 = arith.constant 0 : i32
    %0 = arith.cmpi eq, %arg1, %c0_i32 : i32
    %1 = arith.extui %0 : i1 to i32
    %c0_i32_0 = arith.constant 0 : i32
    %2 = arith.cmpi ne, %1, %c0_i32_0 : i32
    scf.if %2 {
      %c0_6 = arith.constant 0 : index
      %c0_7 = arith.constant 0 : index
      %7 = vector.load %arg2[%c0_6, %c0_7] : memref<8x16xf32, #tpu.memory_space<vmem>>, vector<8x16xf32>
      %cst_8 = arith.constant -1.000000e+00 : f32
      %8 = vector.broadcast %cst_8 : f32 to vector<8x16xf32>
      %9 = arith.maximumf %7, %8 : vector<8x16xf32>
      %c0_9 = arith.constant 0 : index
      %c0_10 = arith.constant 0 : index
      %10 = vector.load %arg4[%c0_9, %c0_10] : memref<16x128xf32, #tpu.memory_space<vmem>>, vector<16x128xf32>
      %cst_11 = arith.constant dense<0.000000e+00> : vector<8x128xf32>
      %11 = tpu.matmul %9, %10, %cst_11 {dimension_numbers = #tpu.dot_dimension_numbers<[1], [0], [0], [1], [0, 0, 1, 1], [], []>} : vector<8x16xf32>, vector<16x128xf32>, vector<8x128xf32> -> vector<8x128xf32>
      %c0_12 = arith.constant 0 : index
      %c0_13 = arith.constant 0 : index
      %12 = vector.load %arg3[%c0_12, %c0_13] : memref<4x128xf32, #tpu.memory_space<vmem>>, vector<4x128xf32>
      %13 = vector.extract_strided_slice %12 {offsets = [0, 0], sizes = [1, 128], strides = [1, 1]} : vector<4x128xf32> to vector<1x128xf32>
      %14 = vector.extract_strided_slice %12 {offsets = [1, 0], sizes = [1, 128], strides = [1, 1]} : vector<4x128xf32> to vector<1x128xf32>
      %15 = vector.extract_strided_slice %12 {offsets = [2, 0], sizes = [1, 128], strides = [1, 1]} : vector<4x128xf32> to vector<1x128xf32>
      %16 = vector.extract_strided_slice %12 {offsets = [3, 0], sizes = [1, 128], strides = [1, 1]} : vector<4x128xf32> to vector<1x128xf32>
      %17 = vector.broadcast %13 : vector<1x128xf32> to vector<8x128xf32>
      %18 = arith.cmpf oge, %11, %17 : vector<8x128xf32>
      %19 = vector.broadcast %14 : vector<1x128xf32> to vector<8x128xf32>
      %20 = arith.cmpf olt, %11, %19 : vector<8x128xf32>
      %21 = arith.andi %18, %20 : vector<8x128xi1>
      %22 = vector.broadcast %15 : vector<1x128xf32> to vector<8x128xf32>
      %23 = arith.subf %11, %22 : vector<8x128xf32>
      %24 = vector.broadcast %16 : vector<1x128xf32> to vector<8x128xf32>
      %25 = arith.mulf %23, %24 : vector<8x128xf32>
      %cst_14 = arith.constant 0.000000e+00 : f32
      %26 = vector.broadcast %cst_14 : f32 to vector<8x128xf32>
      %27 = arith.select %21, %25, %26 : vector<8x128xi1>, vector<8x128xf32>
      %c0_15 = arith.constant 0 : index
      %c0_16 = arith.constant 0 : index
      %28 = vector.load %arg7[%c0_15, %c0_16] : memref<8x128xf32, #tpu.memory_space<vmem>>, vector<8x128xf32>
      tpu.vector_store %arg7[%c0_15, %c0_16], %27 {strides = array<i32>} : memref<8x128xf32, #tpu.memory_space<vmem>>, vector<8x128xf32>,
    } else {
    }
    %c0 = arith.constant 0 : index
    %c0_1 = arith.constant 0 : index
    %3 = vector.load %arg7[%c0, %c0_1] : memref<8x128xf32, #tpu.memory_space<vmem>>, vector<8x128xf32>
    %c0_2 = arith.constant 0 : index
    %c0_3 = arith.constant 0 : index
    %4 = vector.load %arg5[%c0_2, %c0_3] : memref<128x128xf32, #tpu.memory_space<vmem>>, vector<128x128xf32>
    %cst = arith.constant dense<0.000000e+00> : vector<8x128xf32>
    %5 = tpu.matmul %3, %4, %cst {dimension_numbers = #tpu.dot_dimension_numbers<[1], [0], [0], [1], [0, 0, 1, 1], [], []>} : vector<8x128xf32>, vector<128x128xf32>, vector<8x128xf32> -> vector<8x128xf32>
    %c0_4 = arith.constant 0 : index
    %c0_5 = arith.constant 0 : index
    %6 = vector.load %arg6[%c0_4, %c0_5] : memref<8x128xf32, #tpu.memory_space<vmem>>, vector<8x128xf32>
    tpu.vector_store %arg6[%c0_4, %c0_5], %5 {strides = array<i32>} : memref<8x128xf32, #tpu.memory_space<vmem>>, vector<8x128xf32>,
    return
  }
  func.func @transform_0(%arg0: i32, %arg1: i32) -> (i32, i32) {
    %c0_i32 = arith.constant 0 : i32
    %c0_i32_0 = arith.constant 0 : i32
    return %arg0, %c0_i32 : i32, i32
  }
  func.func @transform_1(%arg0: i32, %arg1: i32) -> (i32, i32) {
    %c0_i32 = arith.constant 0 : i32
    %c0_i32_0 = arith.constant 0 : i32
    %c0_i32_1 = arith.constant 0 : i32
    return %c0_i32, %c0_i32_0 : i32, i32
  }
  func.func @transform_2(%arg0: i32, %arg1: i32) -> (i32, i32) {
    %c0_i32 = arith.constant 0 : i32
    %c0_i32_0 = arith.constant 0 : i32
    %c0_i32_1 = arith.constant 0 : i32
    return %c0_i32, %c0_i32_0 : i32, i32
  }
  func.func @transform_3(%arg0: i32, %arg1: i32) -> (i32, i32) {
    %c0_i32 = arith.constant 0 : i32
    %c0_i32_0 = arith.constant 0 : i32
    return %c0_i32, %arg1 : i32, i32
  }
  func.func @transform_4(%arg0: i32, %arg1: i32) -> (i32, i32) {
    %c0_i32 = arith.constant 0 : i32
    return %arg0, %arg1 : i32, i32
  }
}

</mosaic_0001>

<bundles_post_ra>
// kernel: tpu_custom_call.1
= control target key start
LH: loop header
LB: loop body
LE: loop exit
PB: predicated region body
PF: predicated region fallthrough
CT: control target
= control target key end

     0   :  { %9 = vsyncpa [#allocation4], 0  ;;  %s510_s0 = inlined_call_operand.hbm [shape: f32[8,16], index: 0, kind: input, shape index: {}]   ;;  %s511_s1 = inlined_call_operand.hbm [shape: f32[4,128], index: 1, kind: input, shape index: {}]   ;;  %s512_s2 = inlined_call_operand.hbm [shape: f32[16,128], index: 2, kind: input, shape index: {}]   ;;  %s513_s3 = inlined_call_operand.hbm [shape: f32[128,128], index: 3, kind: input, shape index: {}]   ;;  %s514_s4 = inlined_call_operand.hbm [shape: f32[8,32], index: 4, kind: output, shape index: {}]  }
   0x1   :  { %10 = vsyncpa [#allocation7], 0 }
   0x2   :  { %11 = vsyncpa [#allocation10], 0 }
   0x3   :  { %12 = vsyncpa [#allocation5], 0  ;;  %s461_s15 = smov [#allocation6]   ;;  %s462_s17 = smov [#allocation3]  }
   0x4   :  { %s29_s16 = sshll.u32 %s461_s15, 4  ;;  %s19_s18 = sshll.u32 %s462_s17, 4  ;;  %s30_s16 = int_to_ptr.vmem [resolvable:$true] %s29_s16  ;;  %s20_s18 = int_to_ptr.vmem [resolvable:$true] %s19_s18 }
   0x5   :  { %s361_s19 = scalar_lea.vmem %s30_s16, 64  ;;  %p366_p1 = scmp.lt.s32.totalorder %s30_s16, %s30_s16 }
   0x6   :  { %p362_p0 = scmp.ne.s32.totalorder %s30_s16, %s361_s19  ;;  %p367_p2 = scmp.lt.s32.totalorder %s361_s19, %s361_s19 }
   0x8   :  { %p368_p3 = por %p367_p2, %p366_p1 }
   0xa   :  { %p369_p4 = pnand %p368_p3, %p362_p0 }
   0xc   :  { %372 = shalt.err (!%p369_p4)
}
   0xd   :  { %32 = dma.hbm_to_vmem [thread:$0]  %s511_s1, 64, %s30_s16, [#allocation7]  }
   0xe   :  { %s381_s22 = scalar_lea.vmem %s20_s18, 128  ;;  %p386_p6 = scmp.lt.s32.totalorder %s20_s18, %s20_s18 }
   0xf   :  { %p382_p5 = scmp.ne.s32.totalorder %s20_s18, %s381_s22  ;;  %p387_p7 = scmp.lt.s32.totalorder %s381_s22, %s381_s22 }
  0x11   :  { %p388_p8 = por %p387_p7, %p386_p6 }
  0x13   :  { %p389_p9 = pnand %p388_p8, %p382_p5 }
  0x15   :  { %392 = shalt.err (!%p389_p9)
}
  0x16   :  { %22 = dma.hbm_to_vmem [thread:$0]  %s510_s0, 128, %s20_s18, [#allocation4]  }
  0x17   :  { %s463_s25 = smov [#allocation8]  }
  0x18   :  { %s38_s26 = sshll.u32 %s463_s25, 4  ;;  %s39_s26 = int_to_ptr.vmem [resolvable:$true] %s38_s26 }
  0x19   :  { %s401_s27 = scalar_lea.vmem %s39_s26, 256  ;;  %p406_p11 = scmp.lt.s32.totalorder %s39_s26, %s39_s26 }
  0x1a   :  { %p402_p10 = scmp.ne.s32.totalorder %s39_s26, %s401_s27  ;;  %p407_p12 = scmp.lt.s32.totalorder %s401_s27, %s401_s27 }
  0x1c   :  { %p408_p13 = por %p407_p12, %p406_p11 }
  0x1e   :  { %p409_p0 = pnand %p408_p13, %p402_p10 }
  0x20   :  { %412 = shalt.err (!%p409_p0)
}
  0x21   :  { %s464_s1 = smov 128   ;;  %s465_s28 = smov 8  }
  0x22   :  { %44 = dma.hbm_to_vmem [thread:$0]  %s512_s2, 256, %s39_s26, [#allocation7], %s464_s1, %s464_s1, %s465_s28  }
  0x23   :  { %s466_s5 = smov [#allocation9]  }
  0x24   :  { %s50_s6 = sshll.u32 %s466_s5, 4  ;;  %s51_s6 = int_to_ptr.vmem [resolvable:$true] %s50_s6 }
  0x25   :  { %s421_s0 = scalar_lea.vmem %s51_s6, 2048  ;;  %p426_p2 = scmp.lt.s32.totalorder %s51_s6, %s51_s6 }
  0x26   :  { %p422_p1 = scmp.ne.s32.totalorder %s51_s6, %s421_s0  ;;  %p427_p3 = scmp.lt.s32.totalorder %s421_s0, %s421_s0 }
  0x28   :  { %p428_p4 = por %p427_p3, %p426_p2 }
  0x2a   :  { %p429_p5 = pnand %p428_p4, %p422_p1 }
  0x2c   :  { %432 = shalt.err (!%p429_p5)
}
  0x2d   :  { %56 = dma.hbm_to_vmem [thread:$0]  %s513_s3, 2048, %s51_s6, [#allocation10], %s464_s1, %s464_s1, %s465_s28  }
  0x2e   :  { %453 = dma.done.wait [#allocation4], 128  }
  0x2f   :  { %454 = vsyncadd [#allocation4], 4294967168 }
  0x30   :  { %455 = dma.done.wait [#allocation7], 320  }
  0x31   :  { %456 = vsyncadd [#allocation7], 4294966976 }
  0x32   :  { %457 = dma.done.wait [#allocation10], 2048  }
  0x33   :  { %458 = vsyncadd [#allocation10], 4294965248  ;;  %v467_v0 = vmov 0.0   ;;  %vm468_vm0 = vmmov 0   ;;  %v76_v1 = vld [vmem:[#allocation8 + $0x8] sm:$0xff]  ;;  %v75_v2 = vld [vmem:[#allocation8] sm:$0xff]  ;;  %v152_v21 = vlaneseq }
  0x34   :  { %302 = vmatprep.subr.mxu0 %v467_v0  ;;  %306 = vmatprep.mubr.msk.f32.mxu0 %vm468_vm0, %v467_v0  ;;  %v73_v3 = vld [vmem:[#allocation3] sm:$0xff]  ;;  %vm77_vm1 = vcmask 130048   ;;  %v191_v5 = vld [vmem:[#allocation9 + $0x78] sm:$0xff]  ;;  %v190_v6 = vld [vmem:[#allocation9 + $0x70] sm:$0xff]  ;;  %s469_s2 = smov [#allocation11]  }
  0x35   :  { %309 = vmatprep.subr.mxu1 %v467_v0  ;;  %341 = vmatprep.mubr.msk.f32.mxu1 %vm468_vm0, %v467_v0  ;;  %v74_v4 = vmax.f32 %v73_v3, -1.0  ;;  %v189_v7 = vld [vmem:[#allocation9 + $0x68] sm:$0xff]  ;;  %v188_v8 = vld [vmem:[#allocation9 + $0x60] sm:$0xff]  ;;  %v187_v9 = vld [vmem:[#allocation9 + $0x58] sm:$0xff]  ;;  %v153_v22 = vshrl.u32 %v152_v21, 7  ;;  %s269_s3 = sshll.u32 %s469_s2, 4  ;;  %s270_s3 = int_to_ptr.vmem [resolvable:$true] %s269_s3 }
  0x36   :  { %303 = vmatpush3.msra.mxu0 %v76_v1  ;;  %310 = vmatpush3.msra.mxu1 %v191_v5  ;;  %v186_v10 = vld [vmem:[#allocation9 + $0x50] sm:$0xff]  ;;  %v185_v11 = vld [vmem:[#allocation9 + $0x48] sm:$0xff]  ;;  %v184_v12 = vld [vmem:[#allocation9 + $0x40] sm:$0xff]  ;;  %s433_s9 = scalar_lea.vmem %s270_s3, 128  ;;  %p438_p7 = scmp.lt.s32.totalorder %s270_s3, %s270_s3 }
  0x37   :  { %304 = vmatprep.subr.mxu0 %v467_v0  ;;  %311 = vmatprep.subr.mxu1 %v467_v0  ;;  %v183_v13 = vld [vmem:[#allocation9 + $0x38] sm:$0xff]  ;;  %v182_v14 = vld [vmem:[#allocation9 + $0x30] sm:$0xff]  ;;  %v181_v15 = vld [vmem:[#allocation9 + $0x28] sm:$0xff]  ;;  %v154_v23 = vsub.s32 0, %v153_v22  ;;  %v159_v24 = vsub.s32 1, %v153_v22  ;;  %v165_v25 = vsub.s32 2, %v153_v22  ;;  %p434_p6 = scmp.ne.s32.totalorder %s270_s3, %s433_s9  ;;  %p439_p8 = scmp.lt.s32.totalorder %s433_s9, %s433_s9 }
  0x38   :  { %305 = vmatpush3.msra.mxu0 %v75_v2  ;;  %312 = vmatpush3.msra.mxu1 %v190_v6  ;;  %v180_v16 = vld [vmem:[#allocation9 + $0x20] sm:$0xff]  ;;  %v179_v17 = vld [vmem:[#allocation9 + $0x18] sm:$0xff]  ;;  %v178_v18 = vld [vmem:[#allocation9 + $0x10] sm:$0xff]  ;;  %v170_v27 = vsub.s32 3, %v153_v22 }
  0x39   :  { %307 = vmatmul.mubr.msk.f32.vlgmr.msra.gmra.mxu0 %vm77_vm1, %v74_v4  ;;  %313 = vmatprep.subr.mxu1 %v467_v0  ;;  %v177_v19 = vld [vmem:[#allocation9 + $0x8] sm:$0xff]  ;;  %v176_v20 = vld [vmem:[#allocation9] sm:$0xff]  ;;  %p440_p9 = por %p439_p8, %p438_p7 }
  0x3a   :  { %314 = vmatpush3.msra.mxu1 %v189_v7  ;;  %v151_v26 = vld [vmem:[#allocation6] sm:$0xf] }
  0x3b   :  { %315 = vmatprep.subr.mxu1 %v467_v0  ;;  %v155_v28 = vrot.slane %v151_v26, %v154_v23  ;;  %v160_v29 = vrot.slane %v151_v26, %v159_v24  ;;  %v166_v30 = vrot.slane %v151_v26, %v165_v25  ;;  %v171_v31 = vrot.slane %v151_v26, %v170_v27  ;;  %p441_p10 = pnand %p440_p9, %p434_p6 }
  0x3c   :  { %316 = vmatpush3.msra.mxu1 %v188_v8 }
  0x3d   :  { %317 = vmatprep.subr.mxu1 %v467_v0 }
  0x3e   :  { %318 = vmatpush3.msra.mxu1 %v187_v9 }
  0x3f   :  { %319 = vmatprep.subr.mxu1 %v467_v0 }
  0x40   :  { %320 = vmatpush3.msra.mxu1 %v186_v10 }
  0x41   :  { %321 = vmatprep.subr.mxu1 %v467_v0 }
  0x42   :  { %322 = vmatpush3.msra.mxu1 %v185_v11 }
  0x43   :  { %323 = vmatprep.subr.mxu1 %v467_v0 }
  0x44   :  { %324 = vmatpush3.msra.mxu1 %v184_v12 }
  0x45   :  { %325 = vmatprep.subr.mxu1 %v467_v0 }
  0x46   :  { %326 = vmatpush3.msra.mxu1 %v183_v13 }
  0x47   :  { %327 = vmatprep.subr.mxu1 %v467_v0 }
  0x48   :  { %328 = vmatpush3.msra.mxu1 %v182_v14 }
  0x49   :  { %329 = vmatprep.subr.mxu1 %v467_v0 }
  0x4a   :  { %330 = vmatpush3.msra.mxu1 %v181_v15 }
  0x4b   :  { %331 = vmatprep.subr.mxu1 %v467_v0 }
  0x4c   :  { %332 = vmatpush3.msra.mxu1 %v180_v16 }
  0x4d   :  { %333 = vmatprep.subr.mxu1 %v467_v0 }
  0x4e   :  { %334 = vmatpush3.msra.mxu1 %v179_v17 }
  0x4f   :  { %335 = vmatprep.subr.mxu1 %v467_v0 }
  0x50   :  { %336 = vmatpush3.msra.mxu1 %v178_v18 }
  0x51   :  { %337 = vmatprep.subr.mxu1 %v467_v0 }
  0x52   :  { %338 = vmatpush3.msra.mxu1 %v177_v19 }
  0x53   :  { %339 = vmatprep.subr.mxu1 %v467_v0 }
  0x54   :  { %340 = vmatpush3.msra.mxu1 %v176_v20 }
  0xf9   :  { %v147_v32 = vpop.f32.mrf.mxu0 }
  0xfa   :  { %vm156_vm2 = vcmp.ge.f32.partialorder %v147_v32, %v155_v28  ;;  %vm161_vm3 = vcmp.lt.f32.partialorder %v147_v32, %v160_v29  ;;  %v167_v33 = vsub.f32 %v147_v32, %v166_v30 }
  0xfb   :  { %v308_v34 = vpop.f32.mrf.mxu0  ;;  %vm162_vm4 = vmand %vm156_vm2, %vm161_vm3 }
  0xfc   :  { %v172_v35 = vmul.f32 %v171_v31, %v167_v33 }
  0xfe   :  { %342 = vmatmul.mubr.msk.f32.vlgmr.msra.gmra.mxu1 %vm162_vm4, %v172_v35 }
 0x1be   :  { %v258_v36 = vpop.f32.mrf.mxu1 }
 0x1bf   :  { %262 = vst [vmem:[#allocation11] sm:$0xff] %v258_v36 }
 0x1c0   :  { %v343_v37 = vpop.f32.mrf.mxu1 }
 0x1c1   :  { %444 = shalt.err (!%p441_p10)
}
 0x1c2   :  { %272 = dma.vmem_to_hbm [thread:$0]  %s270_s3, 128, %s514_s4, [#allocation5]  }
 0x1c3   :  { %459 = dma.done.wait [#allocation5], 128  }
 0x1c4   :  { %460 = vsyncadd [#allocation5], 4294967168 }
 0x1c5   :  { %276 = vsyncpa [#allocation4], 1 }
 0x1c6   :  { %277 = vsyncpa [#allocation7], 1 }
 0x1c7   :  { %278 = vsyncpa [#allocation10], 1 }
 0x1c8   :  { %279 = vsyncpa [#allocation5], 1 }

</bundles_post_ra>
